<compile_context>
chip_gen: v7x
topology: tpu7x:2x2x1
jax: 0.10.0
libtpu: 0.0.40
codegen_flags: <defaults>
</compile_context>

<pallas_src>
import jax
import jax.numpy as jnp
from jax.experimental import pallas as pl
from jax.experimental.pallas import tpu as pltpu


def ddfm_kernel(p_ref, i_ref, d_ref, bn1_ref, w_ref, b2_ref, out_ref, mem_ref):
    # NOTE: T must remain the LAST grid axis (marked "arbitrary"): mem_ref
    # carries the LIF membrane state across consecutive t steps of one
    # (batch-block, spatial-tile) program. Do not reorder the grid.
    t = pl.program_id(2)

    # Reset membrane potential at the first time step of each (b, s) tile.
    @pl.when(t == 0)
    def _():
        mem_ref[...] = jnp.zeros_like(mem_ref)

    # Upcast to f32 for all in-kernel math (safe for bf16 I/O).
    p = p_ref[...].astype(jnp.float32)          # (tb, Cin, L), pixels on lanes
    i = i_ref[...].astype(jnp.float32)
    d = d_ref[...].astype(jnp.float32)

    ea = jax.nn.sigmoid(d)                      # edge attention
    # Merge both branch inputs into one (tb, 2*Cin, L) block (fills sublanes):
    # channels [0, Cin)  -> p-branch input (1-ea)*i + p
    # channels [Cin,2Cin)-> i-branch input i + ea*p
    x = jnp.concatenate([(1.0 - ea) * i + p, i + ea * p], axis=1)

    # BN1 (eval mode) == per-channel affine along the merged channel axis.
    # bn1_ref[0] = scale (2*Cin, 1), bn1_ref[1] = bias (2*Cin, 1).
    x = x * bn1_ref[0] + bn1_ref[1]

    # LIF: mem = 0.25*mem + x ; spike = mem > 0.5 ; hard reset (where, not mul).
    m = mem_ref[...] * 0.25 + x
    spike = m > 0.5
    mem_ref[...] = jnp.where(spike, 0.0, m)
    s = spike.astype(jnp.float32)

    # Fused 1x1 convs (BN2 folded into the weights in the wrapper):
    #   out = [s2p*Wp | s2i*Wi] @ [sp; si] + (b2p + b2i)
    w = w_ref[...]                              # (Cout, 2*Cin)
    b2 = b2_ref[...]                            # (Cout, 1)
    for b in range(out_ref.shape[0]):           # static unroll over folded batch
        y = jnp.dot(w, s[b], preferred_element_type=jnp.float32)
        out_ref[b] = (y + b2).astype(out_ref.dtype)


def _vmem_capacity_bytes():
    """Generation-aware VMEM capacity; conservative (v7x-sized) fallback."""
    try:
        info = pltpu.get_tpu_info()
        return int(getattr(info, "vmem_capacity_bytes", 64 << 20))
    except Exception:
        return 64 << 20


def _step_footprint_bytes(tb, tile_hw, cin, cout, io_bytes):
    # 3 inputs + 1 output, double-buffered, in the I/O dtype,
    # plus a single f32 membrane scratch of (tb, 2*Cin, tile_hw).
    return tile_hw * tb * (2 * io_bytes * (3 * cin + cout) + 4 * (2 * cin))


def _choose_tiles(B, cin, cout, HW, io_bytes, vmem_budget):
    """Pick (tb, tile_hw): prefer tile_hw == HW (contiguous DMAs), fold batch
    when HW is small, keep >= 2 parallel grid programs (v7x megacore)."""
    def fp(tb, thw):
        return _step_footprint_bytes(tb, thw, cin, cout, io_bytes) + (64 << 10)

    # Candidate spatial tiles: full HW first, then lane-dense (x128) divisors.
    cands = [HW] + sorted({d for d in range(128, HW, 128) if HW % d == 0},
                          reverse=True)
    tile_hw = next((c for c in cands if fp(1, c) <= vmem_budget), cands[-1])

    # Fold a batch sub-block per grid step when the full-HW tile is small.
    tb = 1
    if tile_hw == HW:
        for cand in sorted(d for d in range(1, B + 1) if B % d == 0):
            if fp(cand, tile_hw) <= vmem_budget:
                tb = cand

    # Megacore balance (v7x has 2 TCs): keep >= 2 parallel programs per step.
    n_hw = HW // tile_hw
    while (B // tb) * n_hw < 2 and tb > 1:
        tb = max(dd for dd in range(1, tb) if B % dd == 0)
    if (B // tb) * n_hw < 2 and tile_hw % 256 == 0:
        tile_hw //= 2

    return tb, tile_hw


def ddfm_v2_pallas(p, i, d, params):
    """p, i, d: [T, B, Cin, H, W] (float32 or bfloat16).
    Returns [T, B, Cout, H, W] in the input dtype."""
    T, B, Cin, H, W = p.shape
    Cout = params["wp"].shape[0]
    HW = H * W
    io_dtype = p.dtype
    io_bytes = jnp.dtype(io_dtype).itemsize

    vmem_cap = _vmem_capacity_bytes()
    vmem_budget = int(0.35 * vmem_cap)        # per-step double-buffered budget
    tb, tile_hw = _choose_tiles(B, Cin, Cout, HW, io_bytes, vmem_budget)
    n_hw = HW // tile_hw
    assert HW % tile_hw == 0 and (tile_hw == HW or tile_hw % 128 == 0)
    assert B % tb == 0

    # Pure reshapes (no transpose -> no extra HBM passes); pixels land on lanes.
    p_f = p.reshape(T, B, Cin, HW)
    i_f = i.reshape(T, B, Cin, HW)
    d_f = d.reshape(T, B, Cin, HW)

    # Stack BN1 affines for both branches over the merged 2*Cin channel axis:
    # row 0 = scale, row 1 = bias (p-branch channels first).
    bn1 = jnp.stack(
        [jnp.concatenate([params["s1p"], params["s1i"]]),
         jnp.concatenate([params["b1p"], params["b1i"]])],
        axis=0).astype(jnp.float32).reshape(2, 2 * Cin, 1)

    # Fold BN2 (eval-mode affine) into the 1x1 conv weights and merge branches:
    #   out = [s2p*Wp | s2i*Wi] @ [sp; si] + (b2p + b2i)
    w_merged = jnp.concatenate(
        [params["wp"] * params["s2p"][:, None],
         params["wi"] * params["s2i"][:, None]], axis=1).astype(jnp.float32)
    b2 = (params["b2p"] + params["b2i"]).astype(jnp.float32).reshape(Cout, 1)

    data_spec = pl.BlockSpec((None, tb, Cin, tile_hw),
                             lambda b, s, t: (t, b, 0, s))
    out_spec = pl.BlockSpec((None, tb, Cout, tile_hw),
                            lambda b, s, t: (t, b, 0, s))
    bn1_spec = pl.BlockSpec((2, 2 * Cin, 1), lambda b, s, t: (0, 0, 0))
    w_spec = pl.BlockSpec((Cout, 2 * Cin), lambda b, s, t: (0, 0))
    b2_spec = pl.BlockSpec((Cout, 1), lambda b, s, t: (0, 0))

    # VMEM limit derived from the actual footprint, capped at ~75% of the
    # physical capacity of this generation (64 MiB v7x / 128 MiB v5e/v6e).
    fp = _step_footprint_bytes(tb, tile_hw, Cin, Cout, io_bytes)
    vmem_limit = int(min(max(2 * fp + (4 << 20), 32 << 20),
                         int(0.75 * vmem_cap)))

    out_flat = pl.pallas_call(
        ddfm_kernel,
        out_shape=jax.ShapeDtypeStruct((T, B, Cout, HW), io_dtype),
        grid_spec=pltpu.PrefetchScalarGridSpec(
            num_scalar_prefetch=0,
            # T stays innermost ("arbitrary"): the membrane scratch carries
            # state across consecutive t iterations of each (b, s) program.
            grid=(B // tb, n_hw, T),
            in_specs=[data_spec, data_spec, data_spec,
                      bn1_spec, w_spec, b2_spec],
            out_specs=out_spec,
            scratch_shapes=[pltpu.VMEM((tb, 2 * Cin, tile_hw), jnp.float32)],
        ),
        compiler_params=pltpu.CompilerParams(
            dimension_semantics=("parallel", "parallel", "arbitrary"),
            vmem_limit_bytes=vmem_limit),
    )(p_f, i_f, d_f, bn1, w_merged, b2)

    return out_flat.reshape(T, B, Cout, H, W)


def ddfm_v2_reference(p, i, d, params):
    """Pure-JAX f32 reference of the same forward (unfused BN2), for checking."""
    p = p.astype(jnp.float32)
    i = i.astype(jnp.float32)
    d = d.astype(jnp.float32)
    T = p.shape[0]
    ea = jax.nn.sigmoid(d)
    xp = (1.0 - ea) * i + p
    xi = i + ea * p

    def bcast(v):
        return v[None, None, :, None, None]

    def branch(x, s1, b1, w, s2, b2):
        x = x * bcast(s1) + bcast(b1)
        u = jnp.zeros_like(x[0])
        outs = []
        for t in range(T):
            m = u * 0.25 + x[t]
            sp = (m > 0.5).astype(jnp.float32)
            u = m * (1.0 - sp)
            outs.append(sp)
        sp = jnp.stack(outs)                                   # [T,B,Cin,H,W]
        y = jnp.einsum("tbchw,oc->tbohw", sp, w)
        return y * bcast(s2) + bcast(b2)

    yp = branch(xp, params["s1p"], params["b1p"], params["wp"],
                params["s2p"], params["b2p"])
    yi = branch(xi, params["s1i"], params["b1i"], params["wi"],
                params["s2i"], params["b2i"])
    return yp + yi


def make_params(key, cin, cout, eps=1e-5):
    """Deterministic synthetic BN / conv parameters (eval-mode BN affines)."""
    ks = jax.random.split(key, 6)

    def bn_affine(kg, kb, km, kv, c):
        gamma = 1.0 + 0.1 * jax.random.normal(kg, (c,), jnp.float32)
        beta = 0.1 * jax.random.normal(kb, (c,), jnp.float32)
        mean = 0.1 * jax.random.normal(km, (c,), jnp.float32)
        var = jnp.abs(jax.random.normal(kv, (c,), jnp.float32)) + 0.5
        scale = gamma / jnp.sqrt(var + eps)
        bias = beta - mean * scale
        return scale, bias

    s1p, b1p = bn_affine(*jax.random.split(ks[0], 4), cin)
    s1i, b1i = bn_affine(*jax.random.split(ks[1], 4), cin)
    s2p, b2p = bn_affine(*jax.random.split(ks[2], 4), cout)
    s2i, b2i = bn_affine(*jax.random.split(ks[3], 4), cout)

    # Conv2d(kernel_size=1, bias=False): torch weight [Cout,Cin,1,1] -> [Cout,Cin]
    wp = 0.3 * jax.random.normal(ks[4], (cout, cin), jnp.float32)
    wi = 0.3 * jax.random.normal(ks[5], (cout, cin), jnp.float32)

    return dict(s1p=s1p, b1p=b1p, s1i=s1i, b1i=b1i,
                s2p=s2p, b2p=b2p, s2i=s2i, b2i=b2i,
                wp=wp, wi=wi)


if __name__ == "__main__":
    # small shapes: T (temporal bins) = 4, B = 2, Cin = 4, Cout = 8, H = W = 16
    T, B, Cin, Cout, H, W = 4, 2, 4, 8, 16, 16

    key = jax.random.PRNGKey(0)
    kp, ki, kd, kparams = jax.random.split(key, 4)
    p32 = jax.random.normal(kp, (T, B, Cin, H, W), jnp.float32)
    i32 = jax.random.normal(ki, (T, B, Cin, H, W), jnp.float32)
    d32 = jax.random.normal(kd, (T, B, Cin, H, W), jnp.float32)
    params = make_params(kparams, Cin, Cout)

    # f32 I/O path (tight check against the pure-JAX reference).
    out32 = jax.block_until_ready(ddfm_v2_pallas(p32, i32, d32, params))
    ref32 = jax.block_until_ready(ddfm_v2_reference(p32, i32, d32, params))
    assert out32.shape == (T, B, Cout, H, W)
    assert jnp.allclose(out32, ref32, atol=1e-4, rtol=1e-4), "f32 mismatch"

    # bf16 I/O path (halves HBM traffic; compute stays f32 inside the kernel).
    p16 = p32.astype(jnp.bfloat16)
    i16 = i32.astype(jnp.bfloat16)
    d16 = d32.astype(jnp.bfloat16)
    out16 = jax.block_until_ready(ddfm_v2_pallas(p16, i16, d16, params))
    ref16 = jax.block_until_ready(ddfm_v2_reference(p16, i16, d16, params))
    assert out16.dtype == jnp.bfloat16
    assert jnp.allclose(out16.astype(jnp.float32), ref16,
                        atol=3e-2, rtol=3e-2), "bf16 mismatch"

    print("KERNEL_OK")
</pallas_src>

<mosaic_0001>
module attributes {stable_mosaic.version = 11 : i64} {
  func.func @ddfm_kernel(%arg0: i32, %arg1: i32, %arg2: i32, %arg3: memref<1x1x4x256xf32, #tpu.memory_space<vmem>>, %arg4: memref<1x1x4x256xf32, #tpu.memory_space<vmem>>, %arg5: memref<1x1x4x256xf32, #tpu.memory_space<vmem>>, %arg6: memref<2x8x1xf32, #tpu.memory_space<vmem>>, %arg7: memref<8x8xf32, #tpu.memory_space<vmem>>, %arg8: memref<8x1xf32, #tpu.memory_space<vmem>>, %arg9: memref<1x1x8x256xf32, #tpu.memory_space<vmem>>, %arg10: memref<1x8x256xf32, #tpu.memory_space<vmem>>) attributes {dimension_semantics = [#tpu.dimension_semantics<parallel>, #tpu.dimension_semantics<parallel>, #tpu.dimension_semantics<arbitrary>], iteration_bounds = array<i64: 2, 1, 4>, scalar_prefetch = 0 : i64, scratch_operands = 1 : i64, tpu.core_type = #tpu.core_type<tc>, window_params = [{transform_indices = @transform_0, window_bounds = array<i64: 1, 1, 4, 256>}, {transform_indices = @transform_1, window_bounds = array<i64: 1, 1, 4, 256>}, {transform_indices = @transform_2, window_bounds = array<i64: 1, 1, 4, 256>}, {pipeline_mode = #tpu.pipeline_mode<synchronous>, transform_indices = @transform_3, window_bounds = array<i64: 2, 8, 1>}, {pipeline_mode = #tpu.pipeline_mode<synchronous>, transform_indices = @transform_4, window_bounds = array<i64: 8, 8>}, {pipeline_mode = #tpu.pipeline_mode<synchronous>, transform_indices = @transform_5, window_bounds = array<i64: 8, 1>}, {transform_indices = @transform_6, window_bounds = array<i64: 1, 1, 8, 256>}]} {
    %c0_i32 = arith.constant 0 : i32
    %0 = arith.cmpi eq, %arg2, %c0_i32 : i32
    %1 = arith.extui %0 : i1 to i32
    %c0_i32_0 = arith.constant 0 : i32
    %2 = arith.cmpi ne, %1, %c0_i32_0 : i32
    scf.if %2 {
      %cst_36 = arith.constant 0.000000e+00 : f32
      %51 = vector.broadcast %cst_36 : f32 to vector<1x8x256xf32>
      %c0_37 = arith.constant 0 : index
      %c0_38 = arith.constant 0 : index
      %c0_39 = arith.constant 0 : index
      %52 = vector.load %arg10[%c0_37, %c0_38, %c0_39] : memref<1x8x256xf32, #tpu.memory_space<vmem>>, vector<1x8x256xf32>
      tpu.vector_store %arg10[%c0_37, %c0_38, %c0_39], %51 {strides = array<i32>} : memref<1x8x256xf32, #tpu.memory_space<vmem>>, vector<1x8x256xf32>,
    } else {
    }
    %c0 = arith.constant 0 : index
    %c0_1 = arith.constant 0 : index
    %c0_2 = arith.constant 0 : index
    %c0_3 = arith.constant 0 : index
    %3 = vector.load %arg3[%c0, %c0_1, %c0_2, %c0_3] : memref<1x1x4x256xf32, #tpu.memory_space<vmem>>, vector<1x1x4x256xf32>
    %4 = vector.shape_cast %3 : vector<1x1x4x256xf32> to vector<1x4x256xf32>
    %c0_4 = arith.constant 0 : index
    %c0_5 = arith.constant 0 : index
    %c0_6 = arith.constant 0 : index
    %c0_7 = arith.constant 0 : index
    %5 = vector.load %arg4[%c0_4, %c0_5, %c0_6, %c0_7] : memref<1x1x4x256xf32, #tpu.memory_space<vmem>>, vector<1x1x4x256xf32>
    %6 = vector.shape_cast %5 : vector<1x1x4x256xf32> to vector<1x4x256xf32>
    %c0_8 = arith.constant 0 : index
    %c0_9 = arith.constant 0 : index
    %c0_10 = arith.constant 0 : index
    %c0_11 = arith.constant 0 : index
    %7 = vector.load %arg5[%c0_8, %c0_9, %c0_10, %c0_11] : memref<1x1x4x256xf32, #tpu.memory_space<vmem>>, vector<1x1x4x256xf32>
    %8 = vector.shape_cast %7 : vector<1x1x4x256xf32> to vector<1x4x256xf32>
    %9 = arith.negf %8 : vector<1x4x256xf32>
    %10 = math.exp %9 : vector<1x4x256xf32>
    %cst = arith.constant 1.000000e+00 : f32
    %11 = vector.broadcast %cst : f32 to vector<1x4x256xf32>
    %12 = arith.addf %11, %10 : vector<1x4x256xf32>
    %13 = arith.divf %11, %12 : vector<1x4x256xf32>
    %cst_12 = arith.constant 1.000000e+00 : f32
    %14 = vector.broadcast %cst_12 : f32 to vector<1x4x256xf32>
    %15 = arith.subf %14, %13 : vector<1x4x256xf32>
    %16 = arith.mulf %15, %6 : vector<1x4x256xf32>
    %17 = arith.addf %16, %4 : vector<1x4x256xf32>
    %18 = arith.mulf %13, %4 : vector<1x4x256xf32>
    %19 = arith.addf %6, %18 : vector<1x4x256xf32>
    %20 = tpu.concatenate %17, %19 in 1 : vector<1x4x256xf32>, vector<1x4x256xf32> -> vector<1x8x256xf32>
    %c0_13 = arith.constant 0 : index
    %c0_14 = arith.constant 0 : index
    %c0_15 = arith.constant 0 : index
    %21 = vector.load %arg6[%c0_13, %c0_14, %c0_15] : memref<2x8x1xf32, #tpu.memory_space<vmem>>, vector<1x8x1xf32>
    %22 = vector.shape_cast %21 : vector<1x8x1xf32> to vector<8x1xf32>
    %23 = vector.shape_cast %22 : vector<8x1xf32> to vector<1x8x1xf32>
    %24 = vector.broadcast %23 : vector<1x8x1xf32> to vector<1x8x256xf32>
    %25 = arith.mulf %20, %24 : vector<1x8x256xf32>
    %c1 = arith.constant 1 : index
    %c0_16 = arith.constant 0 : index
    %c0_17 = arith.constant 0 : index
    %26 = vector.load %arg6[%c1, %c0_16, %c0_17] : memref<2x8x1xf32, #tpu.memory_space<vmem>>, vector<1x8x1xf32>
    %27 = vector.shape_cast %26 : vector<1x8x1xf32> to vector<8x1xf32>
    %28 = vector.shape_cast %27 : vector<8x1xf32> to vector<1x8x1xf32>
    %29 = vector.broadcast %28 : vector<1x8x1xf32> to vector<1x8x256xf32>
    %30 = arith.addf %25, %29 : vector<1x8x256xf32>
    %c0_18 = arith.constant 0 : index
    %c0_19 = arith.constant 0 : index
    %c0_20 = arith.constant 0 : index
    %31 = vector.load %arg10[%c0_18, %c0_19, %c0_20] : memref<1x8x256xf32, #tpu.memory_space<vmem>>, vector<1x8x256xf32>
    %cst_21 = arith.constant 2.500000e-01 : f32
    %32 = vector.broadcast %cst_21 : f32 to vector<1x8x256xf32>
    %33 = arith.mulf %31, %32 : vector<1x8x256xf32>
    %34 = arith.addf %33, %30 : vector<1x8x256xf32>
    %cst_22 = arith.constant 5.000000e-01 : f32
    %35 = vector.broadcast %cst_22 : f32 to vector<1x8x256xf32>
    %36 = arith.cmpf ogt, %34, %35 : vector<1x8x256xf32>
    %cst_23 = arith.constant 0.000000e+00 : f32
    %37 = vector.broadcast %cst_23 : f32 to vector<1x8x256xf32>
    %38 = arith.select %36, %37, %34 : vector<1x8x256xi1>, vector<1x8x256xf32>
    %c0_24 = arith.constant 0 : index
    %c0_25 = arith.constant 0 : index
    %c0_26 = arith.constant 0 : index
    %39 = vector.load %arg10[%c0_24, %c0_25, %c0_26] : memref<1x8x256xf32, #tpu.memory_space<vmem>>, vector<1x8x256xf32>
    tpu.vector_store %arg10[%c0_24, %c0_25, %c0_26], %38 {strides = array<i32>} : memref<1x8x256xf32, #tpu.memory_space<vmem>>, vector<1x8x256xf32>,
    %40 = arith.extui %36 : vector<1x8x256xi1> to vector<1x8x256xi32>
    %41 = arith.sitofp %40 : vector<1x8x256xi32> to vector<1x8x256xf32>
    %c0_27 = arith.constant 0 : index
    %c0_28 = arith.constant 0 : index
    %42 = vector.load %arg7[%c0_27, %c0_28] : memref<8x8xf32, #tpu.memory_space<vmem>>, vector<8x8xf32>
    %c0_29 = arith.constant 0 : index
    %c0_30 = arith.constant 0 : index
    %43 = vector.load %arg8[%c0_29, %c0_30] : memref<8x1xf32, #tpu.memory_space<vmem>>, vector<8x1xf32>
    %44 = vector.shape_cast %41 : vector<1x8x256xf32> to vector<8x256xf32>
    %cst_31 = arith.constant dense<0.000000e+00> : vector<8x256xf32>
    %45 = tpu.matmul %42, %44, %cst_31 {dimension_numbers = #tpu.dot_dimension_numbers<[1], [0], [0], [1], [0, 0, 1, 1], [], []>} : vector<8x8xf32>, vector<8x256xf32>, vector<8x256xf32> -> vector<8x256xf32>
    %46 = vector.broadcast %43 : vector<8x1xf32> to vector<8x256xf32>
    %47 = arith.addf %45, %46 : vector<8x256xf32>
    %c0_32 = arith.constant 0 : index
    %c0_33 = arith.constant 0 : index
    %c0_34 = arith.constant 0 : index
    %c0_35 = arith.constant 0 : index
    %48 = vector.load %arg9[%c0_32, %c0_33, %c0_34, %c0_35] : memref<1x1x8x256xf32, #tpu.memory_space<vmem>>, vector<1x1x8x256xf32>
    %49 = vector.shape_cast %48 : vector<1x1x8x256xf32> to vector<8x256xf32>
    %50 = vector.shape_cast %47 : vector<8x256xf32> to vector<1x1x8x256xf32>
    tpu.vector_store %arg9[%c0_32, %c0_33, %c0_34, %c0_35], %50 {strides = array<i32>} : memref<1x1x8x256xf32, #tpu.memory_space<vmem>>, vector<1x1x8x256xf32>,
    return
  }
  func.func @transform_0(%arg0: i32, %arg1: i32, %arg2: i32) -> (i32, i32, i32, i32) {
    %c0_i32 = arith.constant 0 : i32
    %c0_i32_0 = arith.constant 0 : i32
    return %arg2, %arg0, %c0_i32, %arg1 : i32, i32, i32, i32
  }
  func.func @transform_1(%arg0: i32, %arg1: i32, %arg2: i32) -> (i32, i32, i32, i32) {
    %c0_i32 = arith.constant 0 : i32
    %c0_i32_0 = arith.constant 0 : i32
    return %arg2, %arg0, %c0_i32, %arg1 : i32, i32, i32, i32
  }
  func.func @transform_2(%arg0: i32, %arg1: i32, %arg2: i32) -> (i32, i32, i32, i32) {
    %c0_i32 = arith.constant 0 : i32
    %c0_i32_0 = arith.constant 0 : i32
    return %arg2, %arg0, %c0_i32, %arg1 : i32, i32, i32, i32
  }
  func.func @transform_3(%arg0: i32, %arg1: i32, %arg2: i32) -> (i32, i32, i32) {
    %c0_i32 = arith.constant 0 : i32
    %c0_i32_0 = arith.constant 0 : i32
    %c0_i32_1 = arith.constant 0 : i32
    %c0_i32_2 = arith.constant 0 : i32
    return %c0_i32, %c0_i32_0, %c0_i32_1 : i32, i32, i32
  }
  func.func @transform_4(%arg0: i32, %arg1: i32, %arg2: i32) -> (i32, i32) {
    %c0_i32 = arith.constant 0 : i32
    %c0_i32_0 = arith.constant 0 : i32
    %c0_i32_1 = arith.constant 0 : i32
    return %c0_i32, %c0_i32_0 : i32, i32
  }
  func.func @transform_5(%arg0: i32, %arg1: i32, %arg2: i32) -> (i32, i32) {
    %c0_i32 = arith.constant 0 : i32
    %c0_i32_0 = arith.constant 0 : i32
    %c0_i32_1 = arith.constant 0 : i32
    return %c0_i32, %c0_i32_0 : i32, i32
  }
  func.func @transform_6(%arg0: i32, %arg1: i32, %arg2: i32) -> (i32, i32, i32, i32) {
    %c0_i32 = arith.constant 0 : i32
    %c0_i32_0 = arith.constant 0 : i32
    return %arg2, %arg0, %c0_i32, %arg1 : i32, i32, i32, i32
  }
}

</mosaic_0001>

<bundles_post_ra>
// kernel: tpu_custom_call.1
= control target key start
LH: loop header
LB: loop body
LE: loop exit
PB: predicated region body
PF: predicated region fallthrough
CT: control target
= control target key end

     0   :  { %s1374_s0 = inlined_call_operand.hbm [shape: f32[4,2,4,256], index: 0, kind: input, shape index: {}]   ;;  %s1375_s1 = inlined_call_operand.hbm [shape: f32[4,2,4,256], index: 1, kind: input, shape index: {}]   ;;  %s1376_s2 = inlined_call_operand.hbm [shape: f32[4,2,4,256], index: 2, kind: input, shape index: {}]   ;;  %s1377_s3 = inlined_call_operand.vmem [shape: f32[2,8,1], index: 3, kind: input, shape index: {}]   ;;  %s1378_s4 = inlined_call_operand.vmem [shape: f32[8,8], index: 4, kind: input, shape index: {}]   ;;  %s1379_s5 = inlined_call_operand.vmem [shape: f32[8,1], index: 5, kind: input, shape index: {}]   ;;  %s1380_s6 = inlined_call_operand.hbm [shape: f32[4,2,8,256], index: 6, kind: output, shape index: {}]  }
   0x1   :  { %1393 = sst [smem:[#allocation21_spill]] %s1375_s1 }
   0x2   :  { %11 = vsyncpa [#allocation4], 0 }
   0x3   :  { %13 = vsyncpa [#allocation4 + $0x1], 0 }
   0x4   :  { %14 = vsyncpa [#allocation7], 0 }
   0x5   :  { %16 = vsyncpa [#allocation7 + $0x1], 0 }
   0x6   :  { %17 = vsyncpa [#allocation5], 0 }
   0x7   :  { %19 = vsyncpa [#allocation5 + $0x1], 0  ;;  %s1074_s21 = smov 0   ;;  %s1076_s22 = smov 0  }
   0x8   :  { %s1078_s23 = smov 0   ;;  %s1080_s24 = smov 0  }
   0x9   :  { %s1082_s25 = smov 0   ;;  %s1084_s26 = smov 0  }
   0xa   :  { %s1086_s27 = smov 0   ;;  %s1088_s28 = smov 0  }
   0xb LB: > { %1394 = sst [smem:[#allocation13_spill]] %s1001_s21  ;;  %s1115_s29 = sadd.s32 4294967295, %s1029_s28   ;;  %s1029_s28 = sphi %s1088_s28, %s25_s28   ;;  %s1025_s27 = sphi %s1086_s27, %s1425_s27   ;;  %s1021_s26 = sphi %s1084_s26, %s1424_s26   ;;  %s1017_s25 = sphi %s1082_s25, %s1423_s25   ;;  %s1013_s24 = sphi %s1080_s24, %s1422_s24   ;;  %s1009_s23 = sphi %s1078_s23, %s1421_s23   ;;  %s1005_s22 = sphi %s1076_s22, %s1427_s22   ;;  %s1001_s21 = sphi %s1074_s21, %s1426_s21  }
   0xc   : > { %1395 = sst [smem:[#allocation14_spill]] %s1009_s23  ;;  %s705_s30 = sadd.s32 4294967294, %s1029_s28  }
   0xd   : > { %1396 = sst [smem:[#allocation15_spill]] %s1021_s26  ;;  %s37_s7 = sadd.s32 1, %s1021_s26 }
   0xe   : > { %1397 = sst [smem:[#allocation16_spill]] %s1025_s27  ;;  %s44_s8 = sadd.s32 1, %s1025_s27 }
   0xf   : > { %p38_p0 = scmp.ge.s32.totalorder %s37_s7, 4  ;;  %s55_s9 = sadd.s32 1, %s1009_s23 }
  0x10   : > { %p62_p1 = scmp.ne.s32.totalorder %s1009_s23, %s1005_s22  ;;  %p63_p2 = scmp.eq.s32.totalorder %s1029_s28, 0 }
  0x11   : > { %s1429_s7 = smov (%p38_p0, %s37_s7), 0  ;;  %s1431_s8 = smov (!%p38_p0, %s44_s8), %s1025_s27 }
  0x12   : > { %1398 = sst [smem:[#allocation17_spill]] %s1429_s7  ;;  %s48_s10 = ssub.s32 %s1021_s26, %s1429_s7 }
  0x13   : > { %p1129_p3 = por %p63_p2, %p62_p1  ;;  %p46_p4 = scmp.ge.s32.totalorder %s1431_s8, 2 }
  0x14   : > { %p68_p5 = scmp.ne.s32.totalorder %s1005_s22, %s1001_s21  ;;  %p69_p6 = scmp.eq.s32.totalorder %s1115_s29, 0 }
  0x15   : > { %p219_p7 = scmp.eq.s32.totalorder %s1115_s29, 7  ;;  %s1433_s8 = smov (%p46_p4, %s1431_s8), 0 }
  0x16   : > { %1400 = sst [smem:[#allocation18_spill]] %s1433_s8  ;;  %p1139_p8 = por %p69_p6, %p68_p5 }
  0x17   : > { %p1143_p9 = por %p219_p7, %p62_p1  ;;  %s49_s14 = ssub.s32 %s1025_s27, %s1433_s8 }
  0x18   : > { %s1401_s12 = scalar_select %p1139_p8, 1, 0 }
  0x19   : > { %s1402_s13 = scalar_select %p1143_p9, 1, 0 }
  0x1a   : > { %p225_p10 = scmp.eq.s32.totalorder %s705_s30, 7  ;;  %s50_s15 = sor.u32 %s49_s14, %s48_s10 }
  0x1b   : > { %p53_p11 = scmp.eq.s32.totalorder %s50_s15, 0  ;;  %p761_p13 = scmp.lt.s32.totalorder %s1029_s28, 8 }
  0x1c   : > { %p1149_p12 = por %p225_p10, %p68_p5  ;;  %s1383_s17 = sand.u32 1, %s1009_s23  }
  0x1d   : > { %s1156_s18 = scalar_select %p53_p11, %s1009_s23, %s55_s9  }
  0x1e   : > { %s1403_s16 = scalar_select %p1149_p12, 1, 0 }
  0x1f   : > { %1405 = sst [smem:[#allocation20_spill]] %s1156_s18  ;;  %s1160_s19 = sshll.u32 %s1383_s17, 3 }
  0x20   : > { %1404 = sst [smem:[#allocation19_spill]] %s1403_s16  ;;  %s709_s20 = sshll.u32 %s1025_s27, 1 }
  0x21   : > { %s710_s7 = sshll.u32 %s1021_s26, 2  ;;  %p1166_p0 = pnand %p761_p13, %p1129_p3 }
  0x22   : > { %s266_s10 = sadd.s32 %s710_s7, %s709_s20  ;;  %s277_s14 = sand.u32 1, %s1029_s28  }
  0x23   : > { %s1406_s30 = scalar_select %p1166_p0, 1, 0 }
  0x24   : > { %s1171_s15 = sshll.u32 %s266_s10, 6  ;;  %s1407_s1 = sld [smem:[#allocation21_spill]] }
  0x25   : > { %s281_s11 = scalar_lea.vmem [#allocation6], %s1160_s19  ;;  %s1183_s27 = scalar_lea.sflag [#allocation7], %s277_s14 }
  0x26   : > { %s293_s17 = sshll.u32 %s281_s11, 4  ;;  %p1189_p3 = pneg %p1166_p0  ;;  %s1180_s17 = int_to_ptr.vmem [resolvable:$true] %s293_s17 }
  0x2a   : > { %s1177_s18 = scalar_lea.hbm %s1407_s1, %s1171_s15  ;;  %s842_s9 = scalar_lea.hbm %s1407_s1, 1024 }
  0x2b   : > { %s837_s7 = scalar_lea.hbm %s1177_s18, 128  ;;  %p843_p6 = scmp.lt.u32.totalorder %s1177_s18, %s1407_s1 }
  0x2c   : > { %p838_p2 = scmp.ne.s32.totalorder %s1177_s18, %s837_s7  ;;  %p844_p7 = scmp.lt.u32.totalorder %s842_s9, %s837_s7 }
  0x2d   : > { %p846_p11 = scmp.lt.u32.totalorder %s837_s7, %s1177_s18 }
  0x2e   : > { %p840_p4 = pnand %p1189_p3, %p838_p2  ;;  %p845_p10 = por %p844_p7, %p843_p6 }
  0x30   : > { %p841_p5 = pneg %p840_p4  ;;  %p847_p13 = por %p846_p11, %p845_p10 }
  0x32   : > { %p848_p1 = pnand %p847_p13, %p841_p5 }
  0x34   : > { %851 = shalt.err (!%p848_p1)
}
  0x35   : > { %s852_s14 = scalar_lea.vmem %s1180_s17, 128  ;;  %s1031_s8 = smov [#allocation6]  }
  0x36   : > { %p853_p2 = scmp.ne.s32.totalorder %s1180_s17, %s852_s14  ;;  %s857_s10 = sshll.u32 %s1031_s8, 4  ;;  %s858_s10 = int_to_ptr.vmem [resolvable:$false] %s857_s10 }
  0x37   : > { %s859_s26 = scalar_lea.vmem %s858_s10, 256  ;;  %p860_p9 = scmp.lt.s32.totalorder %s1180_s17, %s858_s10 }
  0x38   : > { %p855_p4 = pnand %p853_p2, %p1189_p3  ;;  %p861_p8 = scmp.lt.s32.totalorder %s859_s26, %s852_s14 }
  0x3a   : > { %p856_p12 = pneg %p855_p4  ;;  %p862_p6 = por %p861_p8, %p860_p9 }
  0x3c   : > { %p863_p7 = pnand %p862_p6, %p856_p12 }
  0x3e   : > { %866 = shalt.err (!%p863_p7)
}
  0x3f   : > { %753 = dma.hbm_to_vmem [thread:$0]  (!%p1166_p0), %s1177_s18, 128, %s1180_s17, %s1183_s27  }
  0x40   : > { %p321_p1 = scmp.lt.s32.totalorder %s1029_s28, 9  ;;  %p1409_p5 = scmp.ge.s32.totalorder %s1029_s28, 1 }
  0x41   : > { %s1224_s14 = scalar_lea.hbm %s1374_s0, %s1171_s15  ;;  %s258_s8 = scalar_lea.vmem [#allocation3], %s1160_s19 }
  0x42   : > { %p1216_p10 = pnand %p1409_p5, %p321_p1  ;;  %s270_s10 = sshll.u32 %s258_s8, 4  ;;  %s271_s10 = int_to_ptr.vmem [resolvable:$true] %s270_s10 }
  0x43   : > { %s1411_s26 = sand.u32 1, %s1009_s23   ;;  %s867_s18 = scalar_lea.hbm %s1224_s14, 128 }
  0x44   : > { %s1410_s7 = scalar_select %p1216_p10, 1, 0 }
  0x45   : > { %s255_s17 = scalar_lea.sflag [#allocation4], %s1411_s26  ;;  %p868_p8 = scmp.ne.s32.totalorder %s1224_s14, %s867_s18 }
  0x46   : > { %s872_s9 = scalar_lea.hbm %s1374_s0, 1024  ;;  %p873_p11 = scmp.lt.u32.totalorder %s1224_s14, %s1374_s0 }
  0x47   : > { %p870_p9 = pnand %p868_p8, %p1189_p3  ;;  %p874_p13 = scmp.lt.u32.totalorder %s872_s9, %s867_s18 }
  0x48   : > { %p876_p4 = scmp.lt.u32.totalorder %s867_s18, %s1224_s14 }
  0x49   : > { %p871_p12 = pneg %p870_p9  ;;  %p875_p2 = por %p874_p13, %p873_p11 }
  0x4b   : > { %p877_p6 = por %p876_p4, %p875_p2 }
  0x4d   : > { %p878_p7 = pnand %p877_p6, %p871_p12 }
  0x4f   : > { %881 = shalt.err (!%p878_p7)
}
  0x50   : > { %s882_s8 = scalar_lea.vmem %s271_s10, 128  ;;  %s1032_s26 = smov [#allocation3]  }
  0x51   : > { %p883_p1 = scmp.ne.s32.totalorder %s271_s10, %s882_s8  ;;  %s887_s23 = sshll.u32 %s1032_s26, 4  ;;  %s888_s23 = int_to_ptr.vmem [resolvable:$false] %s887_s23 }
  0x52   : > { %s889_s1 = scalar_lea.vmem %s888_s23, 256  ;;  %p890_p9 = scmp.lt.s32.totalorder %s271_s10, %s888_s23 }
  0x53   : > { %p885_p5 = pnand %p883_p1, %p1189_p3  ;;  %p891_p10 = scmp.lt.s32.totalorder %s889_s1, %s882_s8 }
  0x55   : > { %p886_p8 = pneg %p885_p5  ;;  %p892_p0 = por %p891_p10, %p890_p9 }
  0x57   : > { %p893_p11 = pnand %p892_p0, %p886_p8 }
  0x59   : > { %896 = shalt.err (!%p893_p11)
}
  0x5a   : > { %p1412_p13 = scmp.ne.s32.totalorder %s1406_s30, 0  ;;  %s1250_s18 = scalar_lea.hbm %s1376_s2, %s1171_s15 }
  0x5b   : > { %s304_s23 = scalar_lea.vmem [#allocation8], %s1160_s19  ;;  %s897_s11 = scalar_lea.hbm %s1250_s18, 128 }
  0x5c   : > { %750 = dma.hbm_to_vmem [thread:$0]  (!%p1412_p13), %s1224_s14, 128, %s271_s10, %s255_s17  }
  0x5d   : > { %s316_s9 = sshll.u32 %s304_s23, 4  ;;  %p898_p0 = scmp.ne.s32.totalorder %s1250_s18, %s897_s11  ;;  %s317_s9 = int_to_ptr.vmem [resolvable:$true] %s316_s9 }
  0x5e   : > { %s902_s14 = scalar_lea.hbm %s1376_s2, 1024  ;;  %p903_p2 = scmp.lt.u32.totalorder %s1250_s18, %s1376_s2 }
  0x5f   : > { %p900_p10 = pnand %p898_p0, %p1189_p3  ;;  %p904_p4 = scmp.lt.u32.totalorder %s902_s14, %s897_s11 }
  0x60   : > { %p906_p7 = scmp.lt.u32.totalorder %s897_s11, %s1250_s18 }
  0x61   : > { %p901_p12 = pneg %p900_p10  ;;  %p905_p6 = por %p904_p4, %p903_p2 }
  0x63   : > { %p907_p1 = por %p906_p7, %p905_p6 }
  0x65   : > { %p908_p5 = pnand %p907_p1, %p901_p12 }
  0x67   : > { %911 = shalt.err (!%p908_p5)
}
  0x68   : > { %s912_s19 = scalar_lea.vmem %s317_s9, 128  ;;  %s1033_s15 = smov [#allocation8]  }
  0x69   : > { %p913_p8 = scmp.ne.s32.totalorder %s317_s9, %s912_s19  ;;  %s917_s1 = sshll.u32 %s1033_s15, 4  ;;  %s918_s1 = int_to_ptr.vmem [resolvable:$false] %s917_s1 }
  0x6a   : > { %s919_s21 = scalar_lea.vmem %s918_s1, 256  ;;  %p920_p0 = scmp.lt.s32.totalorder %s317_s9, %s918_s1 }
  0x6b   : > { %p915_p9 = pnand %p913_p8, %p1189_p3  ;;  %p921_p10 = scmp.lt.s32.totalorder %s919_s21, %s912_s19 }
  0x6d   : > { %p916_p11 = pneg %p915_p9  ;;  %p922_p13 = por %p921_p10, %p920_p0 }
  0x6f   : > { %p923_p2 = pnand %p922_p13, %p916_p11 }
  0x71   : > { %926 = shalt.err (!%p923_p2)
}
  0x72   : > { %p1413_p4 = scmp.ne.s32.totalorder %s1406_s30, 0  ;;  %p1414_p12 = scmp.ne.s32.totalorder %s1410_s7, 0 }
  0x73   : > { %s1274_s20 = sand.u32 (!%p1414_p12), 1, %s1005_s22   ;;  %p1415_p3 = scmp.ne.s32.totalorder (!%p1414_p12), %s1401_s12, 0 }
  0x74   : > { %756 = dma.hbm_to_vmem [thread:$0]  (!%p1413_p4), %s1250_s18, 128, %s317_s9, %s1183_s27  }
  0x75   : > { %325 = sbr.rel (%p1414_p12) target bundleno = 508 (0x1fc), region = 44  ;;  %s1277_s16 = sshll.u32 (!%p1414_p12), %s1274_s20, 3 }
  0x76   : > { %s328_s23 = scalar_lea.sflag (!%p1414_p12), [#allocation4], %s1274_s20  ;;  %s331_s11 = scalar_lea.vmem (!%p1414_p12), [#allocation3], %s1277_s16 }
  0x7c   : > { %988 = dma.done.wait (%p1415_p3), %s328_s23, 128  }
  0x7d   : > { %990 = vsyncadd (%p1415_p3), %s328_s23, 4294967168  ;;  %s336_s27 = sand.u32 1, %s1115_s29   ;;  %s340_s7 = scalar_lea.vmem [#allocation6], %s1277_s16 }
  0x7e   : > { %s337_s30 = scalar_lea.sflag [#allocation7], %s336_s27 }
  0x7f   : > { %992 = dma.done.wait (%p1415_p3), %s337_s30, 256  }
  0x80   : > { %994 = vsyncadd (%p1415_p3), %s337_s30, 4294967040  ;;  %s724_s18 = sshll.u32 %s1274_s20, 4  ;;  %s349_s9 = scalar_lea.vmem [#allocation8], %s1277_s16 }
  0x81   : > { %s1293_s8 = scalar_lea.vmem [#allocation9], %s724_s18  ;;  %p725_p13 = scmp.ne.s32.totalorder %s1013_s24, 0 }
  0x82   : > { %v1034_v0 = vmov (!%p725_p13), 0.0  }
  0x83   : > { %395 = sbr.rel (%p725_p13) target bundleno = 138 (0x8a), region = 60  ;;  %396 = vst [vmem:[#allocation2] sm:$0xff] (!%p725_p13), %v1034_v0  ;;  %397 = vst [vmem:[#allocation2 + $0x8] sm:$0xff] (!%p725_p13), %v1034_v0 }
  0x8a PF: > { %v421_v1 = vld [vmem:[%s1377_s3] sm:$0xff]  ;;  %v1035_v2 = vmov 0   ;;  %v727_v3 = vld [vmem:[%s1377_s3 + $0x8] sm:$0xff]  ;;  %v1036_v4 = vmov 0.0   ;;  %v400_v6 = vld [vmem:[%s349_s9] sm:$0xff]  ;;  %vm418_vm0 = vcmask 1043456  }
  0x8b   : > { %831 = vset.pattern.permute.xlu0 %v1035_v2  ;;  %832 = vset.pattern.permute.xlu1 %v1035_v2  ;;  %v455_v5 = vld [vmem:[%s1379_s5] sm:$0xff]  ;;  %v726_v7 = vmul.f32 -1.442695, %v400_v6  ;;  %v398_v12 = vld [vmem:[%s331_s11] sm:$0xff]  ;;  %v439_v24 = vld [vmem:[#allocation2 + $0x8] sm:$0xff]  ;;  %vm461_vm3 = vcmask 64512  }
  0x8c   : > { %424 = vperm.xlu0 %831, %v421_v1   ;;  %529 = vmatprep.mubr.f32.mxu0 %v1036_v4  ;;  %v399_v13 = vld [vmem:[%s340_s7] sm:$0xff]  ;;  %v441_v28 = vmul.f32 0.25, %v439_v24  ;;  %v1037_v36 = vmov 1.0   ;;  %s734_s1 = sshll.u32 %s1017_s25, 1  ;;  %s735_s21 = sshll.u32 %s1013_s24, 2 }
  0x8d   : > { %458 = vperm.xlu1 %832, %v455_v5   ;;  %833 = vpow2.f32 %v726_v7  ;;  %v438_v23 = vld [vmem:[#allocation2] sm:$0xff]  ;;  %s553_s16 = sadd.s32 %s735_s21, %s734_s1  ;;  %s557_s11 = sshll.u32 %s1293_s8, 4  ;;  %s1320_s11 = int_to_ptr.vmem [resolvable:$true] %s557_s11 }
  0x8e   : > { %v440_v27 = vmul.f32 0.25, %v438_v23  ;;  %v454_v34 = vld [vmem:[%s1378_s4] sm:$0xff]  ;;  %s736_s23 = sshll.u32 %s553_s16, 7  ;;  %s539_s24 = scalar_lea.sflag [#allocation5], %s1274_s20 }
  0x8f   : > { %s1318_s7 = scalar_lea.hbm %s1380_s6, %s736_s23  ;;  %s927_s25 = scalar_lea.vmem %s1320_s11, 256 }
  0x90   : > { %433 = vperm.xlu0 %831, %v727_v3   ;;  %p928_p6 = scmp.ne.s32.totalorder %s1320_s11, %s927_s25  ;;  %p1416_p7 = scmp.ne.s32.totalorder %s1402_s13, 0 }
  0x91   : > { %s1038_s18 = smov [#allocation9]  }
  0x92   : > { %p929_p1 = pnand %p928_p6, %p1416_p7  ;;  %s931_s9 = sshll.u32 %s1038_s18, 4  ;;  %s932_s9 = int_to_ptr.vmem [resolvable:$false] %s931_s9 }
  0x93   : > { %s933_s29 = scalar_lea.vmem %s932_s9, 512  ;;  %p934_p8 = scmp.lt.s32.totalorder %s1320_s11, %s932_s9 }
  0x94   : > { %p930_p5 = pneg %p929_p1  ;;  %p935_p9 = scmp.lt.s32.totalorder %s933_s29, %s927_s25 }
  0x96   : > { %p936_p11 = por %p935_p9, %p934_p8 }
  0x97   : > { %v834_v8 = vpop.eup %833 }
  0x98   : > { %v404_v9 = vadd.f32 1.0, %v834_v8  ;;  %p937_p0 = pnand %p936_p11, %p930_p5 }
  0x9a   : > { %835 = vrcp.f32 %v404_v9 }
  0xa4   : > { %v836_v10 = vpop.eup %835 }
  0xa5   : > { %v407_v11 = vsub.f32 1.0, %v836_v10  ;;  %v410_v15 = vmul.f32 %v836_v10, %v398_v12 }
  0xa7   : > { %v408_v14 = vmul.f32 %v407_v11, %v399_v13  ;;  %v411_v17 = vadd.f32 %v410_v15, %v399_v13 }
  0xa9   : > { %v409_v16 = vadd.f32 %v408_v14, %v398_v12  ;;  %v416_v19 = vcombine.low %v411_v17, %v411_v17 }
  0xab   : > { %v413_v18 = vcombine.high %v409_v16, %v409_v16  ;;  %v419_v21 = vsel %vm418_vm0, %v409_v16, %v416_v19 }
  0xad   : > { %v420_v22 = vsel %vm418_vm0, %v413_v18, %v411_v17 }
 0x10b   : > { %v425_v20 = vpop.permute.xlu0 %424 }
 0x10c   : > { %v427_v25 = vmul.f32 %v425_v20, %v419_v21  ;;  %v428_v26 = vmul.f32 %v425_v20, %v420_v22  ;;  %v459_v38 = vpop.permute.xlu1 %458 }
 0x10f   : > { %v434_v29 = vpop.permute.xlu0 %433 }
 0x110   : > { %v436_v30 = vadd.f32 %v434_v29, %v427_v25  ;;  %v437_v31 = vadd.f32 %v434_v29, %v428_v26 }
 0x112   : > { %v442_v32 = vadd.f32 %v440_v27, %v436_v30  ;;  %v443_v33 = vadd.f32 %v441_v28, %v437_v31 }
 0x114   : > { %vm445_vm1 = vcmp.gt.f32.partialorder %v443_v33, 0.5  ;;  %vm444_vm2 = vcmp.gt.f32.partialorder %v442_v32, 0.5 }
 0x115   : > { %v447_v35 = vsel %vm445_vm1, 0.0, %v443_v33  ;;  %730 = vmatprep.subr.msk.mxu0 %vm445_vm1, %v1037_v36  ;;  %v446_v37 = vsel %vm444_vm2, 0.0, %v442_v32 }
 0x116   : > { %449 = vst [vmem:[#allocation2 + $0x8] sm:$0xff] %v447_v35  ;;  %448 = vst [vmem:[#allocation2] sm:$0xff] %v446_v37  ;;  %731 = vmatpush1.msk.msra.mxu0 %vm444_vm2, %v1037_v36 }
 0x117   : > { %732 = vmatmul.mubr.msk.f32.vlgmr.msra.gmra.mrb[0].mxu0 %vm461_vm3, %v454_v34 }
 0x1ea   : > { %v531_v39 = vpop.f32.mrb[0].mxu0 }
 0x1eb   : > { %v532_v40 = vadd.f32 %v531_v39, %v459_v38  ;;  %v533_v41 = vpop.f32.mrb[1].mxu0 }
 0x1ec   : > { %v534_v42 = vadd.f32 %v533_v41, %v459_v38 }
 0x1ed   : > { %536 = vst [vmem:[%s1293_s8] sm:$0xff] %v532_v40 }
 0x1ee   : > { %537 = vst [vmem:[%s1293_s8 + $0x8] sm:$0xff] %v534_v42 }
 0x1ef   : > { %940 = shalt.err (!%p937_p0)
}
 0x1f0   : > { %s941_s20 = scalar_lea.hbm %s1318_s7, 256  ;;  %s945_s12 = scalar_lea.hbm %s1380_s6, 2048 }
 0x1f1   : > { %p942_p10 = scmp.ne.s32.totalorder %s1318_s7, %s941_s20  ;;  %p946_p12 = scmp.lt.u32.totalorder %s1318_s7, %s1380_s6 }
 0x1f2   : > { %p947_p3 = scmp.lt.u32.totalorder %s945_s12, %s941_s20  ;;  %p949_p6 = scmp.lt.u32.totalorder %s941_s20, %s1318_s7 }
 0x1f3   : > { %p943_p2 = pnand %p942_p10, %p1416_p7 }
 0x1f4   : > { %p948_p13 = por %p947_p3, %p946_p12 }
 0x1f5   : > { %p944_p4 = pneg %p943_p2 }
 0x1f6   : > { %p950_p1 = por %p949_p6, %p948_p13 }
 0x1f8   : > { %p951_p5 = pnand %p950_p1, %p944_p4 }
 0x1fa   : > { %954 = shalt.err (!%p951_p5)
}
 0x1fb   : > { %745 = dma.vmem_to_hbm [thread:$0]  (%p1416_p7), %s1320_s11, 256, %s1318_s7, %s539_s24  }
 0x1fc PF: > { %s1417_s17 = sld [smem:[#allocation13_spill]]  ;;  %s1418_s19 = sld [smem:[#allocation19_spill]] }
 0x1fd   : > { %p762_p8 = scmp.ge.s32.totalorder %s1029_s28, 2 }
 0x202   : > { %s569_s15 = sand.u32 1, %s1417_s17   ;;  %p1419_p9 = scmp.ne.s32.totalorder %s1418_s19, 0 }
 0x203   : > { %s570_s1 = scalar_lea.sflag [#allocation5], %s569_s15 }
 0x204   : > { %p758_p11 = pnand %p762_p8, %p1419_p9 }
 0x206   : > { %996 = dma.done.wait (!%p758_p11), %s570_s1, 256  }
 0x207   : > { %998 = vsyncadd (!%p758_p11), %s570_s1, 4294967040  ;;  %s25_s28 = sadd.s32 1, %s1029_s28   ;;  %s1420_s16 = sld [smem:[#allocation14_spill]] }
 0x208   : > { %p22_p0 = scmp.ge.s32.totalorder %s25_s28, 10   ;;  %s1421_s23 = sld [smem:[#allocation20_spill]] }
 0x209   : > { %s1422_s24 = sld [smem:[#allocation15_spill]]  ;;  %s1423_s25 = sld [smem:[#allocation16_spill]] }
 0x20a   : > { %s1424_s26 = sld [smem:[#allocation17_spill]]  ;;  %s1425_s27 = sld [smem:[#allocation18_spill]] }
 0x20b   : > { %s1426_s21 = smov %s1005_s22  ;;  %24 = sbr.rel (!%p22_p0) target bundleno = 11 (0xb), region = 118 }
 0x20d   : > { %s1427_s22 = smov %s1420_s16 }
 0x212   :  { %575 = vsyncpa [#allocation4], 1 }
 0x213   :  { %577 = vsyncpa [#allocation4 + $0x1], 1 }
 0x214   :  { %578 = vsyncpa [#allocation7], 1 }
 0x215   :  { %580 = vsyncpa [#allocation7 + $0x1], 1 }
 0x216   :  { %581 = vsyncpa [#allocation5], 1 }
 0x217   :  { %583 = vsyncpa [#allocation5 + $0x1], 1 }

</bundles_post_ra>
